<compile_context>
chip_gen: v6e
topology: v6e:2x2x1
jax: 0.10.0
libtpu: 0.0.40
codegen_flags: <defaults>
</compile_context>

<pallas_src>
import functools

import jax
import jax.numpy as jnp
from jax.experimental import pallas as pl
from jax.experimental.pallas import tpu as pltpu

NUM_CLASSES = 5   # cfg['particle_image_classifier']['num_classes'] default
LATENT = 32       # encoder.latent_size (small synthetic value)


def _round_up(x, m):
    return ((x + m - 1) // m) * m


def _chip_config():
    """Returns (elementwise/activation dtype, max HW tile, scoped VMEM limit bytes)."""
    try:
        kind = jax.devices()[0].device_kind.lower()
    except Exception:
        kind = ""
    if "v7" in kind:
        # v7x: 64 MiB VMEM per TensorCore, bf16 VPU.
        return jnp.bfloat16, 32768, 56 * 2**20
    if "v6" in kind:
        # v6e: 128 MiB VMEM, bf16 VPU.
        return jnp.bfloat16, 65536, 100 * 2**20
    if "v5" in kind:
        # v5e/v5p: keep elementwise math in f32 (v5e VPU has no bf16); big VMEM.
        return jnp.float32, 65536, 100 * 2**20
    # Unknown / older generations: conservative defaults.
    return jnp.float32, 8192, None


def _encoder_classifier_kernel(x_ref, w_stem_ref, b_stem_ref, w_res_ref, b_res_ref,
                               wfc_ref, bfc_ref, out_ref, acc_ref,
                               *, hw, hw_tile, hw_padded, act_dtype):
    t = pl.program_id(1)
    n_t = pl.num_programs(1)
    act = act_dtype

    @pl.when(t == 0)
    def _():
        acc_ref[...] = jnp.zeros_like(acc_ref)

    # x block: (1, C, hw_tile) -> (C, hw_tile); voxels on lanes, channels on sublanes.
    # Already bf16 (pre-cast in the wrapper) -> no in-kernel cast, half the DMA bytes.
    x = x_ref[0]

    # Stem: pointwise conv C -> LATENT, ReLU.   (LATENT, C) @ (C, HWt) -> (LATENT, HWt)
    feat = jnp.dot(w_stem_ref[...], x, preferred_element_type=jnp.float32).astype(act)
    feat = jnp.maximum(feat + b_stem_ref[...].astype(act), 0.0)

    # Two residual blocks (pointwise conv -> ReLU -> pointwise conv, skip, ReLU).
    # Weights packed lane-dense as (LATENT, 4*LATENT); biases as (LATENT, 4).
    # The last block's output is kept in f32 so pooling accumulates in f32 for free.
    for blk in range(2):
        wa = w_res_ref[:, (2 * blk) * LATENT:(2 * blk + 1) * LATENT]
        wb = w_res_ref[:, (2 * blk + 1) * LATENT:(2 * blk + 2) * LATENT]
        ba = b_res_ref[:, 2 * blk:2 * blk + 1].astype(act)       # (LATENT, 1), tiny cast
        bb = b_res_ref[:, 2 * blk + 1:2 * blk + 2]                # stays f32

        h = jnp.dot(wa, feat, preferred_element_type=jnp.float32).astype(act)
        h = jnp.maximum(h + ba, 0.0)
        h = jnp.dot(wb, h, preferred_element_type=jnp.float32) + bb   # f32
        if blk == 0:
            feat = jnp.maximum(feat + h.astype(act), 0.0)              # stays act dtype
        else:
            feat = jnp.maximum(feat.astype(jnp.float32) + h, 0.0)      # f32 for pooling

    def _accumulate(f):
        acc_ref[...] += jnp.sum(f, axis=1, keepdims=True)              # (LATENT, 1) f32

    # Padding columns only exist in the last HW tile; only that tile pays the mask.
    if hw_padded != hw:
        @pl.when(t == n_t - 1)
        def _():
            col = t * hw_tile + jax.lax.broadcasted_iota(jnp.int32, (1, hw_tile), 1)
            _accumulate(jnp.where(col < hw, feat, 0.0))

        @pl.when(t < n_t - 1)
        def _():
            _accumulate(feat)
    else:
        _accumulate(feat)

    # Final tile: mean (scale by precomputed 1/HW), FC head, store logits.
    @pl.when(t == n_t - 1)
    def _():
        latent = acc_ref[...] * (1.0 / hw)                             # (LATENT, 1) f32
        logits = jnp.dot(wfc_ref[...], latent,
                         preferred_element_type=jnp.float32) + bfc_ref[...]
        out_ref[...] = logits.reshape(1, NUM_CLASSES, 1).astype(out_ref.dtype)


def particle_image_classifier(x_nchw, params):
    """Forward pass. x_nchw: (B, C, H, W) float32 (PyTorch NCHW convention)."""
    B, C, H, W = x_nchw.shape
    HW = H * W

    act_dtype, max_hw_tile, vmem_limit = _chip_config()

    # Free, contiguous reshape: channels stay on sublanes, voxels go to the lane axis.
    # Pre-cast to bf16: matmul inputs are bf16 anyway, and this halves the input DMA.
    x = x_nchw.reshape(B, C, HW).astype(jnp.bfloat16)

    hw_tile = min(max_hw_tile, _round_up(HW, 128))
    hw_padded = _round_up(HW, hw_tile)
    if hw_padded != HW:
        x = jnp.pad(x, ((0, 0), (0, 0), (0, hw_padded - HW)))
    n_tiles = hw_padded // hw_tile

    w_stem, b_stem, w_res, b_res, wfc, bfc = params
    w_stem_bf = w_stem.astype(jnp.bfloat16)      # (LATENT, C)
    w_res_bf = w_res.astype(jnp.bfloat16)        # (LATENT, 4*LATENT) = (32, 128)

    kernel = functools.partial(_encoder_classifier_kernel,
                               hw=HW, hw_tile=hw_tile, hw_padded=hw_padded,
                               act_dtype=act_dtype)

    in_specs = [
        pl.BlockSpec((1, C, hw_tile), lambda b, t: (b, 0, t)),
        pl.BlockSpec(w_stem_bf.shape, lambda b, t: (0, 0)),
        pl.BlockSpec(b_stem.shape, lambda b, t: (0, 0)),
        pl.BlockSpec(w_res_bf.shape, lambda b, t: (0, 0)),
        pl.BlockSpec(b_res.shape, lambda b, t: (0, 0)),
        pl.BlockSpec(wfc.shape, lambda b, t: (0, 0)),
        pl.BlockSpec(bfc.shape, lambda b, t: (0, 0)),
    ]

    cp_kwargs = dict(dimension_semantics=("parallel", "arbitrary"))
    if vmem_limit is not None:
        cp_kwargs["vmem_limit_bytes"] = vmem_limit

    out = pl.pallas_call(
        kernel,
        out_shape=jax.ShapeDtypeStruct((B, NUM_CLASSES, 1), jnp.float32),
        grid=(B, n_tiles),
        in_specs=in_specs,
        out_specs=pl.BlockSpec((1, NUM_CLASSES, 1), lambda b, t: (b, 0, 0)),
        scratch_shapes=[pltpu.VMEM((LATENT, 1), jnp.float32)],
        compiler_params=pltpu.CompilerParams(**cp_kwargs),
    )(x, w_stem_bf, b_stem, w_res_bf, b_res, wfc, bfc)

    logits = out[:, :, 0]                                       # (B, NUM_CLASSES)
    return {'logits': [logits]}


def init_params(key, in_channels):
    """PyTorch-style uniform(+-1/sqrt(fan_in)) init, stored in transposed (W^T) layout.

    Residual weights are packed lane-dense: (LATENT, 4*LATENT); biases (LATENT, 4).
    """
    keys = jax.random.split(key, 6)

    def lin_t(k, fan_in, fan_out):
        bound = float(1.0 / (fan_in ** 0.5))
        kw, kb = jax.random.split(k)
        w = jax.random.uniform(kw, (fan_out, fan_in), jnp.float32, -bound, bound)
        b = jax.random.uniform(kb, (fan_out, 1), jnp.float32, -bound, bound)
        return w, b

    w_stem, b_stem = lin_t(keys[0], in_channels, LATENT)         # (LATENT, C), (LATENT, 1)
    res_w, res_b = [], []
    for i in range(4):
        w, b = lin_t(keys[1 + i], LATENT, LATENT)
        res_w.append(w)
        res_b.append(b)
    w_res = jnp.concatenate(res_w, axis=1)                       # (LATENT, 4*LATENT)
    b_res = jnp.concatenate(res_b, axis=1)                       # (LATENT, 4)
    wfc, bfc = lin_t(keys[5], LATENT, NUM_CLASSES)               # (NC, LATENT), (NC, 1)
    return (w_stem, b_stem, w_res, b_res, wfc, bfc)


def _reference(x_nchw, params):
    """Pure-JAX f32 reference with identical math (transposed-weight convention)."""
    w_stem, b_stem, w_res, b_res, wfc, bfc = params
    B, C, H, W = x_nchw.shape
    x = x_nchw.reshape(B, C, H * W).astype(jnp.float32)

    def w_i(i):
        return w_res[:, i * LATENT:(i + 1) * LATENT]

    def b_i(i):
        return b_res[:, i:i + 1]

    feat = jnp.maximum(jnp.einsum('oc,bcn->bon', w_stem, x) + b_stem[None], 0.0)
    for blk in range(2):
        h = jnp.einsum('oc,bcn->bon', w_i(2 * blk), feat) + b_i(2 * blk)[None]
        h = jnp.maximum(h, 0.0)
        h = jnp.einsum('oc,bcn->bon', w_i(2 * blk + 1), h) + b_i(2 * blk + 1)[None]
        feat = jnp.maximum(feat + h, 0.0)
    latent = jnp.mean(feat, axis=-1)                             # (B, LATENT)
    return latent @ wfc.T + bfc[:, 0][None]


if __name__ == "__main__":
    key = jax.random.PRNGKey(0)
    kx, kp = jax.random.split(key)

    B, C, H, W = 2, 4, 16, 16
    x = jax.random.normal(kx, (B, C, H, W), dtype=jnp.float32)
    params = init_params(kp, in_channels=C)

    res = particle_image_classifier(x, params)
    logits = jax.block_until_ready(res['logits'][0])

    assert logits.shape == (B, NUM_CLASSES), logits.shape
    assert bool(jnp.all(jnp.isfinite(logits)))

    ref = _reference(x, params)
    assert bool(jnp.allclose(logits, ref, rtol=5e-2, atol=5e-2)), (logits, ref)

    print("KERNEL_OK")
</pallas_src>

<mosaic_0001>
module attributes {stable_mosaic.version = 11 : i64} {
  func.func @_encoder_classifier_kernel(%arg0: i32, %arg1: i32, %arg2: memref<1x4x256xbf16, #tpu.memory_space<vmem>>, %arg3: memref<32x4xbf16, #tpu.memory_space<vmem>>, %arg4: memref<32x1xf32, #tpu.memory_space<vmem>>, %arg5: memref<32x128xbf16, #tpu.memory_space<vmem>>, %arg6: memref<32x4xf32, #tpu.memory_space<vmem>>, %arg7: memref<5x32xf32, #tpu.memory_space<vmem>>, %arg8: memref<5x1xf32, #tpu.memory_space<vmem>>, %arg9: memref<1x5x1xf32, #tpu.memory_space<vmem>>, %arg10: memref<32x1xf32, #tpu.memory_space<vmem>>) attributes {dimension_semantics = [#tpu.dimension_semantics<parallel>, #tpu.dimension_semantics<arbitrary>], iteration_bounds = array<i64: 2, 1>, scalar_prefetch = 0 : i64, scratch_operands = 1 : i64, tpu.core_type = #tpu.core_type<tc>, window_params = [{transform_indices = @transform_0, window_bounds = array<i64: 1, 4, 256>}, {pipeline_mode = #tpu.pipeline_mode<synchronous>, transform_indices = @transform_1, window_bounds = array<i64: 32, 4>}, {pipeline_mode = #tpu.pipeline_mode<synchronous>, transform_indices = @transform_2, window_bounds = array<i64: 32, 1>}, {pipeline_mode = #tpu.pipeline_mode<synchronous>, transform_indices = @transform_3, window_bounds = array<i64: 32, 128>}, {pipeline_mode = #tpu.pipeline_mode<synchronous>, transform_indices = @transform_4, window_bounds = array<i64: 32, 4>}, {pipeline_mode = #tpu.pipeline_mode<synchronous>, transform_indices = @transform_5, window_bounds = array<i64: 5, 32>}, {pipeline_mode = #tpu.pipeline_mode<synchronous>, transform_indices = @transform_6, window_bounds = array<i64: 5, 1>}, {transform_indices = @transform_7, window_bounds = array<i64: 1, 5, 1>}]} {
    %c0_i32 = arith.constant 0 : i32
    %0 = arith.cmpi eq, %arg1, %c0_i32 : i32
    %1 = arith.extui %0 : i1 to i32
    %c0_i32_0 = arith.constant 0 : i32
    %2 = arith.cmpi ne, %1, %c0_i32_0 : i32
    scf.if %2 {
      %cst_33 = arith.constant 0.000000e+00 : f32
      %50 = vector.broadcast %cst_33 : f32 to vector<32x1xf32>
      %c0_34 = arith.constant 0 : index
      %c0_35 = arith.constant 0 : index
      %51 = vector.load %arg10[%c0_34, %c0_35] : memref<32x1xf32, #tpu.memory_space<vmem>>, vector<32x1xf32>
      tpu.vector_store %arg10[%c0_34, %c0_35], %50 {strides = array<i32>} : memref<32x1xf32, #tpu.memory_space<vmem>>, vector<32x1xf32>,
    } else {
    }
    %c0 = arith.constant 0 : index
    %c0_1 = arith.constant 0 : index
    %c0_2 = arith.constant 0 : index
    %3 = vector.load %arg2[%c0, %c0_1, %c0_2] : memref<1x4x256xbf16, #tpu.memory_space<vmem>>, vector<1x4x256xbf16>
    %4 = vector.shape_cast %3 : vector<1x4x256xbf16> to vector<4x256xbf16>
    %c0_3 = arith.constant 0 : index
    %c0_4 = arith.constant 0 : index
    %5 = vector.load %arg3[%c0_3, %c0_4] : memref<32x4xbf16, #tpu.memory_space<vmem>>, vector<32x4xbf16>
    %cst = arith.constant dense<0.000000e+00> : vector<32x256xf32>
    %6 = tpu.matmul %5, %4, %cst {dimension_numbers = #tpu.dot_dimension_numbers<[1], [0], [0], [1], [0, 0, 1, 1], [], []>} : vector<32x4xbf16>, vector<4x256xbf16>, vector<32x256xf32> -> vector<32x256xf32>
    %c0_5 = arith.constant 0 : index
    %c0_6 = arith.constant 0 : index
    %7 = vector.load %arg4[%c0_5, %c0_6] : memref<32x1xf32, #tpu.memory_space<vmem>>, vector<32x1xf32>
    %8 = vector.broadcast %7 : vector<32x1xf32> to vector<32x256xf32>
    %9 = arith.addf %6, %8 : vector<32x256xf32>
    %cst_7 = arith.constant 0.000000e+00 : f32
    %10 = vector.broadcast %cst_7 : f32 to vector<32x256xf32>
    %11 = arith.maximumf %9, %10 : vector<32x256xf32>
    %c0_8 = arith.constant 0 : index
    %c0_9 = arith.constant 0 : index
    %12 = vector.load %arg5[%c0_8, %c0_9] : memref<32x128xbf16, #tpu.memory_space<vmem>>, vector<32x32xbf16>
    %c0_10 = arith.constant 0 : index
    %c32 = arith.constant 32 : index
    %13 = vector.load %arg5[%c0_10, %c32] : memref<32x128xbf16, #tpu.memory_space<vmem>>, vector<32x32xbf16>
    %c0_11 = arith.constant 0 : index
    %c0_12 = arith.constant 0 : index
    %14 = vector.load %arg6[%c0_11, %c0_12] : memref<32x4xf32, #tpu.memory_space<vmem>>, vector<32x1xf32>
    %c0_13 = arith.constant 0 : index
    %c1 = arith.constant 1 : index
    %15 = vector.load %arg6[%c0_13, %c1] : memref<32x4xf32, #tpu.memory_space<vmem>>, vector<32x1xf32>
    %cst_14 = arith.constant dense<0.000000e+00> : vector<32x256xf32>
    %16 = tpu.matmul %12, %11, %cst_14 {dimension_numbers = #tpu.dot_dimension_numbers<[1], [0], [0], [1], [0, 0, 1, 1], [], []>} : vector<32x32xbf16>, vector<32x256xf32>, vector<32x256xf32> -> vector<32x256xf32>
    %17 = vector.broadcast %14 : vector<32x1xf32> to vector<32x256xf32>
    %18 = arith.addf %16, %17 : vector<32x256xf32>
    %cst_15 = arith.constant 0.000000e+00 : f32
    %19 = vector.broadcast %cst_15 : f32 to vector<32x256xf32>
    %20 = arith.maximumf %18, %19 : vector<32x256xf32>
    %cst_16 = arith.constant dense<0.000000e+00> : vector<32x256xf32>
    %21 = tpu.matmul %13, %20, %cst_16 {dimension_numbers = #tpu.dot_dimension_numbers<[1], [0], [0], [1], [0, 0, 1, 1], [], []>} : vector<32x32xbf16>, vector<32x256xf32>, vector<32x256xf32> -> vector<32x256xf32>
    %22 = vector.broadcast %15 : vector<32x1xf32> to vector<32x256xf32>
    %23 = arith.addf %21, %22 : vector<32x256xf32>
    %24 = arith.addf %11, %23 : vector<32x256xf32>
    %cst_17 = arith.constant 0.000000e+00 : f32
    %25 = vector.broadcast %cst_17 : f32 to vector<32x256xf32>
    %26 = arith.maximumf %24, %25 : vector<32x256xf32>
    %c0_18 = arith.constant 0 : index
    %c64 = arith.constant 64 : index
    %27 = vector.load %arg5[%c0_18, %c64] : memref<32x128xbf16, #tpu.memory_space<vmem>>, vector<32x32xbf16>
    %c0_19 = arith.constant 0 : index
    %c96 = arith.constant 96 : index
    %28 = vector.load %arg5[%c0_19, %c96] : memref<32x128xbf16, #tpu.memory_space<vmem>>, vector<32x32xbf16>
    %c0_20 = arith.constant 0 : index
    %c2 = arith.constant 2 : index
    %29 = vector.load %arg6[%c0_20, %c2] : memref<32x4xf32, #tpu.memory_space<vmem>>, vector<32x1xf32>
    %c0_21 = arith.constant 0 : index
    %c3 = arith.constant 3 : index
    %30 = vector.load %arg6[%c0_21, %c3] : memref<32x4xf32, #tpu.memory_space<vmem>>, vector<32x1xf32>
    %cst_22 = arith.constant dense<0.000000e+00> : vector<32x256xf32>
    %31 = tpu.matmul %27, %26, %cst_22 {dimension_numbers = #tpu.dot_dimension_numbers<[1], [0], [0], [1], [0, 0, 1, 1], [], []>} : vector<32x32xbf16>, vector<32x256xf32>, vector<32x256xf32> -> vector<32x256xf32>
    %32 = vector.broadcast %29 : vector<32x1xf32> to vector<32x256xf32>
    %33 = arith.addf %31, %32 : vector<32x256xf32>
    %cst_23 = arith.constant 0.000000e+00 : f32
    %34 = vector.broadcast %cst_23 : f32 to vector<32x256xf32>
    %35 = arith.maximumf %33, %34 : vector<32x256xf32>
    %cst_24 = arith.constant dense<0.000000e+00> : vector<32x256xf32>
    %36 = tpu.matmul %28, %35, %cst_24 {dimension_numbers = #tpu.dot_dimension_numbers<[1], [0], [0], [1], [0, 0, 1, 1], [], []>} : vector<32x32xbf16>, vector<32x256xf32>, vector<32x256xf32> -> vector<32x256xf32>
    %37 = vector.broadcast %30 : vector<32x1xf32> to vector<32x256xf32>
    %38 = arith.addf %36, %37 : vector<32x256xf32>
    %39 = arith.addf %26, %38 : vector<32x256xf32>
    %cst_25 = arith.constant 0.000000e+00 : f32
    %40 = vector.broadcast %cst_25 : f32 to vector<32x256xf32>
    %41 = arith.maximumf %39, %40 : vector<32x256xf32>
    %c0_26 = arith.constant 0 : index
    %c0_27 = arith.constant 0 : index
    %42 = vector.load %arg10[%c0_26, %c0_27] : memref<32x1xf32, #tpu.memory_space<vmem>>, vector<32x1xf32>
    %cst_28 = arith.constant dense<0.000000e+00> : vector<32xf32>
    %43 = vector.multi_reduction <add>, %41, %cst_28 [1] : vector<32x256xf32> to vector<32xf32>
    %44 = vector.shape_cast %43 : vector<32xf32> to vector<32x1xf32>
    %45 = arith.addf %42, %44 : vector<32x1xf32>
    %c0_29 = arith.constant 0 : index
    %c0_30 = arith.constant 0 : index
    %46 = vector.load %arg10[%c0_29, %c0_30] : memref<32x1xf32, #tpu.memory_space<vmem>>, vector<32x1xf32>
    tpu.vector_store %arg10[%c0_29, %c0_30], %45 {strides = array<i32>} : memref<32x1xf32, #tpu.memory_space<vmem>>, vector<32x1xf32>,
    %c0_i32_31 = arith.constant 0 : i32
    %47 = arith.cmpi eq, %arg1, %c0_i32_31 : i32
    %48 = arith.extui %47 : i1 to i32
    %c0_i32_32 = arith.constant 0 : i32
    %49 = arith.cmpi ne, %48, %c0_i32_32 : i32
    scf.if %49 {
      %c0_33 = arith.constant 0 : index
      %c0_34 = arith.constant 0 : index
      %50 = vector.load %arg10[%c0_33, %c0_34] : memref<32x1xf32, #tpu.memory_space<vmem>>, vector<32x1xf32>
      %cst_35 = arith.constant 3.906250e-03 : f32
      %51 = vector.broadcast %cst_35 : f32 to vector<32x1xf32>
      %52 = arith.mulf %50, %51 : vector<32x1xf32>
      %c0_36 = arith.constant 0 : index
      %c0_37 = arith.constant 0 : index
      %53 = vector.load %arg7[%c0_36, %c0_37] : memref<5x32xf32, #tpu.memory_space<vmem>>, vector<5x32xf32>
      %cst_38 = arith.constant dense<0.000000e+00> : vector<5x1xf32>
      %54 = tpu.matmul %53, %52, %cst_38 {dimension_numbers = #tpu.dot_dimension_numbers<[1], [0], [0], [1], [0, 0, 1, 1], [], []>} : vector<5x32xf32>, vector<32x1xf32>, vector<5x1xf32> -> vector<5x1xf32>
      %c0_39 = arith.constant 0 : index
      %c0_40 = arith.constant 0 : index
      %55 = vector.load %arg8[%c0_39, %c0_40] : memref<5x1xf32, #tpu.memory_space<vmem>>, vector<5x1xf32>
      %56 = arith.addf %54, %55 : vector<5x1xf32>
      %57 = vector.shape_cast %56 : vector<5x1xf32> to vector<1x5x1xf32>
      %c0_41 = arith.constant 0 : index
      %c0_42 = arith.constant 0 : index
      %c0_43 = arith.constant 0 : index
      %58 = vector.load %arg9[%c0_41, %c0_42, %c0_43] : memref<1x5x1xf32, #tpu.memory_space<vmem>>, vector<1x5x1xf32>
      tpu.vector_store %arg9[%c0_41, %c0_42, %c0_43], %57 {strides = array<i32>} : memref<1x5x1xf32, #tpu.memory_space<vmem>>, vector<1x5x1xf32>,
    } else {
    }
    return
  }
  func.func @transform_0(%arg0: i32, %arg1: i32) -> (i32, i32, i32) {
    %c0_i32 = arith.constant 0 : i32
    %c0_i32_0 = arith.constant 0 : i32
    return %arg0, %c0_i32, %arg1 : i32, i32, i32
  }
  func.func @transform_1(%arg0: i32, %arg1: i32) -> (i32, i32) {
    %c0_i32 = arith.constant 0 : i32
    %c0_i32_0 = arith.constant 0 : i32
    %c0_i32_1 = arith.constant 0 : i32
    return %c0_i32, %c0_i32_0 : i32, i32
  }
  func.func @transform_2(%arg0: i32, %arg1: i32) -> (i32, i32) {
    %c0_i32 = arith.constant 0 : i32
    %c0_i32_0 = arith.constant 0 : i32
    %c0_i32_1 = arith.constant 0 : i32
    return %c0_i32, %c0_i32_0 : i32, i32
  }
  func.func @transform_3(%arg0: i32, %arg1: i32) -> (i32, i32) {
    %c0_i32 = arith.constant 0 : i32
    %c0_i32_0 = arith.constant 0 : i32
    %c0_i32_1 = arith.constant 0 : i32
    return %c0_i32, %c0_i32_0 : i32, i32
  }
  func.func @transform_4(%arg0: i32, %arg1: i32) -> (i32, i32) {
    %c0_i32 = arith.constant 0 : i32
    %c0_i32_0 = arith.constant 0 : i32
    %c0_i32_1 = arith.constant 0 : i32
    return %c0_i32, %c0_i32_0 : i32, i32
  }
  func.func @transform_5(%arg0: i32, %arg1: i32) -> (i32, i32) {
    %c0_i32 = arith.constant 0 : i32
    %c0_i32_0 = arith.constant 0 : i32
    %c0_i32_1 = arith.constant 0 : i32
    return %c0_i32, %c0_i32_0 : i32, i32
  }
  func.func @transform_6(%arg0: i32, %arg1: i32) -> (i32, i32) {
    %c0_i32 = arith.constant 0 : i32
    %c0_i32_0 = arith.constant 0 : i32
    %c0_i32_1 = arith.constant 0 : i32
    return %c0_i32, %c0_i32_0 : i32, i32
  }
  func.func @transform_7(%arg0: i32, %arg1: i32) -> (i32, i32, i32) {
    %c0_i32 = arith.constant 0 : i32
    %c0_i32_0 = arith.constant 0 : i32
    %c0_i32_1 = arith.constant 0 : i32
    return %arg0, %c0_i32, %c0_i32_0 : i32, i32, i32
  }
}

</mosaic_0001>

<bundles_post_ra>
// kernel: tpu_custom_call.1
= control target key start
LH: loop header
LB: loop body
LE: loop exit
PB: predicated region body
PF: predicated region fallthrough
CT: control target
= control target key end

     0   :  { %s1293_s24 = smov 0   ;;  %s1295_s25 = smov 0   ;;  %s1558_s0 = inlined_call_operand.vmem [shape: bf16[2,4,256], index: 0, kind: input, shape index: {}]   ;;  %s1559_s1 = inlined_call_operand.vmem [shape: bf16[32,4], index: 1, kind: input, shape index: {}]   ;;  %s1560_s2 = inlined_call_operand.vmem [shape: f32[32,1], index: 2, kind: input, shape index: {}]   ;;  %s1561_s3 = inlined_call_operand.vmem [shape: bf16[32,128], index: 3, kind: input, shape index: {}]   ;;  %s1562_s4 = inlined_call_operand.vmem [shape: f32[32,4], index: 4, kind: input, shape index: {}]   ;;  %s1563_s5 = inlined_call_operand.vmem [shape: f32[5,32], index: 5, kind: input, shape index: {}]   ;;  %s1564_s6 = inlined_call_operand.vmem [shape: f32[5,1], index: 6, kind: input, shape index: {}]   ;;  %s1565_s7 = inlined_call_operand.vmem [shape: f32[2,5,1], index: 7, kind: output, shape index: {}]  }
   0x1   :  { %s1297_s26 = smov 0  }
   0x2 LB: > { %s29_s27 = sadd.s32 1, %s1238_s25  ;;  %p1133_p0 = scmp.ge.s32.totalorder %s1242_s26, 1  ;;  %s1242_s26 = sphi %s1297_s26, %s17_s26   ;;  %s1238_s25 = sphi %s1295_s25, %s1567_s25   ;;  %s1234_s24 = sphi %s1293_s24, %s1566_s24  }
   0x3   : > { %p31_p1 = scmp.ge.s32.totalorder %s29_s27, 2  ;;  %p256_p2 = scmp.lt.s32.totalorder %s1242_s26, 3 }
   0x5   : > { %s1569_s27 = smov (%p31_p1, %s29_s27), 0  ;;  %p257_p3 = pnand %p1133_p0, %p256_p2 }
   0x6   : > { %p292_p4 = scmp.lt.s32.totalorder (!%p257_p3), %s1234_s24, 1  ;;  %s1245_s14 = smov (!%p257_p3), 96  }
   0x7   : > { %260 = sbr.rel (%p257_p3) target bundleno = 1462 (0x5b6), region = 48  ;;  %s1247_s15 = smov (!%p257_p3), 64  }
   0xc   : > { %v1244_v0 = vmov 0   ;;  %s1571_s24 = smov (!%p292_p4, %s1234_s24), 1  ;;  %v323_v1 = vld [vmem:[%s1560_s2 + $0x18] sm:$0xff]  ;;  %v321_v2 = vld [vmem:[%s1560_s2 + $0x8] sm:$0xff]  ;;  %vm370_vm0 = vcmask 1041408   ;;  %v322_v3 = vld [vmem:[%s1560_s2 + $0x10] sm:$0xff] }
   0xd   : > { %409 = vmatprep.mubr.bf16.mxu0 %v1244_v0  ;;  %419 = vmatprep.mubr.bf16.mxu1 %v1244_v0  ;;  %s1156_s9 = sshll.u32 %s1571_s24, 2  ;;  %v320_v4 = vld [vmem:[%s1560_s2] sm:$0xff]  ;;  %v1336_v8 = vld [vmem:[%s1562_s4 + $0x18] sm:$0xff]  ;;  %v1217_v10 = vld [vmem:[%s1559_s1 + $0x8] sm:$0xff]   ;;  %vm363_vm1 = vcmask 31744   ;;  %vm476_vm2 = vcmask 261120  }
   0xe   : > { %1208 = vset.pattern.permute.xlu0 %v1244_v0  ;;  %1209 = vset.pattern.permute.xlu1 %v1244_v0  ;;  %s299_s16 = scalar_lea.vmem %s1558_s0, %s1156_s9  ;;  %v1216_v9 = vld [vmem:[%s1559_s1] sm:$0xff]   ;;  %v1347_v11 = vld [vmem:[%s1562_s4 + $0x10] sm:$0xff]  ;;  %v1353_v12 = vld [vmem:[%s1562_s4 + $0x8] sm:$0xff]  ;;  %v1246_v44 = vmov 1   ;;  %vm310_vm3 = vcmask 7168   ;;  %vm1252_vm4 = vmmov 0  }
   0xf   : > { %341 = vperm.xlu0 %1208, %v323_v1   ;;  %331 = vperm.xlu1 %1209, %v321_v2   ;;  %v1139_v5 = vld.sshfl [vmem:[%s299_s16] sm:$0x33 pattern:$0x76325410]  ;;  %v1373_v15 = vld [vmem:[%s1561_s3 + $0x8] sm:$0xff]   ;;  %s1249_s16 = smov 32  }
  0x10   : > { %v362_v6 = vcombine.high %v1139_v5, %v1139_v5  ;;  %v372_v7 = vsel %vm370_vm0, %v1139_v5, 0  ;;  %v1359_v13 = vld [vmem:[%s1562_s4] sm:$0xff]  ;;  %s1136_s19 = sshll.u32 %s1571_s24, 3  ;;  %vm1060_vm5 = vcmask 4096  }
  0x11   : > { %v1368_v14 = vld [vmem:[%s1561_s3] sm:$0xff]   ;;  %s304_s28 = scalar_lea.vmem %s1565_s7, %s1136_s19 }
  0x12   : > { %1140 = vmatprep.subr.msk.bf16.mxu0 %vm370_vm0, %v362_v6  ;;  %1173 = vmatprep.subr.msk.bf16.mxu1 %vm370_vm0, %v362_v6 }
  0x13   : > { %336 = vperm.xlu0 %1208, %v322_v3   ;;  %326 = vperm.xlu1 %1209, %v320_v4  }
  0x14   : > { %392 = vmatpush1.bf16.msra.mxu0 %v372_v7  ;;  %1174 = vmatpush1.bf16.msra.mxu1 %v372_v7 }
  0x17   : > { %463 = vperm.xlu0 %1208, %v1336_v8   ;;  %458 = vperm.xlu1 %1209, %v1347_v11  }
  0x18   : > { %1141 = vmatmul.mubr.msk.bf16.vlgmr.msra.gmra.mxu0 %vm363_vm1, %v1216_v9  ;;  %1142 = vmatmul.mubr.msk.bf16.vlgmr.msra.gmra.mxu1 %vm363_vm1, %v1217_v10 }
  0x19   : > { %547 = vmatprep.mubr.bf16.mxu1 %v1244_v0  ;;  %666 = vmatprep.mubr.bf16.mxu0 %v1244_v0 }
  0x1b   : > { %453 = vperm.xlu0 %1208, %v1353_v12   ;;  %448 = vperm.xlu1 %1209, %v1359_v13  }
  0x1f   : > { %592 = vrot.lane.b32.xlu0 %v1368_v14, %s1245_s14  ;;  %594 = vrot.lane.b32.xlu1 %v1373_v15, %s1245_s14 }
  0x20   : > { %1210 = vset.pattern.permute.xlu0 %v1246_v44  ;;  %1211 = vset.pattern.permute.xlu1 %v1246_v44 }
  0x23   : > { %589 = vperm.xlu0 %1210, %v1336_v8   ;;  %585 = vperm.xlu1 %1211, %v1347_v11  }
  0x27   : > { %577 = vperm.xlu0 %1210, %v1359_v13   ;;  %581 = vperm.xlu1 %1211, %v1353_v12  }
  0x2b   : > { %719 = vrot.lane.b32.xlu1 %v1368_v14, %s1247_s15  ;;  %721 = vrot.lane.b32.xlu0 %v1373_v15, %s1247_s15 }
  0x8a   : > { %v342_v16 = vpop.permute.xlu0 %341  ;;  %v332_v21 = vpop.permute.xlu1 %331 }
  0x8e   : > { %v337_v24 = vpop.permute.xlu0 %336  ;;  %v327_v33 = vpop.permute.xlu1 %326 }
  0x92   : > { %v464_v50 = vpop.permute.xlu0 %463  ;;  %v459_v52 = vpop.permute.xlu1 %458 }
  0x96   : > { %v454_v58 = vpop.permute.xlu0 %453  ;;  %v449_v62 = vpop.permute.xlu1 %448 }
  0xd8   : > { %v411_v17 = vpop.f32.mrf.mxu0  ;;  %v421_v18 = vpop.f32.mrf.mxu1 }
  0xd9   : > { %v1383_v30 = vadd.f32 %v421_v18, %v337_v24  ;;  %v1396_v38 = vadd.f32 %v411_v17, %v327_v33  ;;  %v595_v17 = vpop.permute.xlu1 %594  ;;  %v1248_v18 = vmov 2  }
  0xda   : > { %v413_v19 = vpop.f32.mrf.mxu0  ;;  %v423_v20 = vpop.f32.mrf.mxu1  ;;  %1212 = vset.pattern.permute.xlu1 %v1248_v18  ;;  %1213 = vset.pattern.permute.xlu0 %v1248_v18 }
  0xdb   : > { %v1379_v28 = vadd.f32 %v423_v20, %v337_v24  ;;  %v1391_v36 = vadd.f32 %v413_v19, %v327_v33  ;;  %v434_v39 = vmax.f32 %v1383_v30, 0.0  ;;  %v430_v43 = vmax.f32 %v1396_v38, 0.0  ;;  %716 = vperm.xlu1 %1212, %v1336_v8   ;;  %712 = vperm.xlu0 %1213, %v1347_v11  }
  0xdc   : > { %v415_v22 = vpop.f32.mrf.mxu0  ;;  %v425_v23 = vpop.f32.mrf.mxu1 }
  0xdd   : > { %v1377_v25 = vadd.f32 %v425_v23, %v342_v16  ;;  %v1388_v34 = vadd.f32 %v415_v22, %v332_v21  ;;  %v435_v37 = vmax.f32 %v1379_v28, 0.0  ;;  %v431_v42 = vmax.f32 %v1391_v36, 0.0  ;;  %v586_v23 = vpop.permute.xlu1 %585 }
  0xde   : > { %v417_v26 = vpop.f32.mrf.mxu0  ;;  %v427_v27 = vpop.f32.mrf.mxu1 }
  0xdf   : > { %v1381_v29 = vadd.f32 %v427_v27, %v342_v16  ;;  %v1385_v31 = vadd.f32 %v417_v26, %v332_v21  ;;  %v436_v35 = vmax.f32 %v1377_v25, 0.0  ;;  %v432_v41 = vmax.f32 %v1388_v34, 0.0  ;;  %v593_v16 = vpop.permute.xlu0 %592  ;;  %708 = vperm.xlu1 %1212, %v1353_v12   ;;  %838 = vrot.lane.b32.xlu0 %v1368_v14, %s1249_s16 }
  0xe1   : > { %v437_v32 = vmax.f32 %v1381_v29, 0.0  ;;  %v433_v40 = vmax.f32 %v1385_v31, 0.0  ;;  %v582_v44 = vpop.permute.xlu1 %581 }
  0xe3   : > { %507 = vmatprep.subr.mxu1 %v437_v32  ;;  %704 = vperm.xlu1 %1212, %v1359_v13   ;;  %v590_v26 = vpop.permute.xlu0 %589 }
  0xe4   : > { %508 = vmatpush1.msra.mxu1 %v436_v35 }
  0xe5   : > { %509 = vmatprep.subr.mxu1 %v435_v37 }
  0xe6   : > { %510 = vmatpush1.msra.mxu1 %v434_v39 }
  0xe7   : > { %511 = vmatprep.subr.mxu1 %v433_v40  ;;  %840 = vrot.lane.b32.xlu1 %v1373_v15, %s1249_s16 }
  0xe8   : > { %512 = vmatpush1.msra.mxu1 %v432_v41 }
  0xe9   : > { %513 = vmatprep.subr.mxu1 %v431_v42 }
  0xea   : > { %514 = vmatpush1.msra.mxu1 %v430_v43 }
  0xeb   : > { %1145 = vmatmul.mubr.msk.bf16.vlgmr.msra.gmra.mxu1 %vm476_vm2, %v1368_v14 }
  0xec   : > { %557 = vmatprep.mubr.bf16.mxu1 %v1244_v0 }
  0xf3   : > { %1146 = vmatmul.mubr.msk.bf16.gmra.mxu1 %vm476_vm2, %v1373_v15 }
  0xf4   : > { %793 = vmatprep.mubr.bf16.mxu1 %v1244_v0 }
 0x1ab   : > { %v549_v45 = vpop.f32.mrf.mxu1 }
 0x1ac   : > { %v550_v4 = vadd.f32 %v549_v45, %v449_v62 }
 0x1ad   : > { %v551_v46 = vpop.f32.mrf.mxu1 }
 0x1ae   : > { %v552_v2 = vadd.f32 %v551_v46, %v449_v62  ;;  %v568_v10 = vmax.f32 %v550_v4, 0.0 }
 0x1af   : > { %v553_v47 = vpop.f32.mrf.mxu1 }
 0x1b0   : > { %v554_v63 = vadd.f32 %v553_v47, %v454_v58  ;;  %v569_v9 = vmax.f32 %v552_v2, 0.0 }
 0x1b1   : > { %v555_v48 = vpop.f32.mrf.mxu1 }
 0x1b2   : > { %v556_v60 = vadd.f32 %v555_v48, %v454_v58  ;;  %v570_v7 = vmax.f32 %v554_v63, 0.0 }
 0x1b3   : > { %v559_v49 = vpop.f32.mrf.mxu1 }
 0x1b4   : > { %v560_v59 = vadd.f32 %v559_v49, %v459_v52  ;;  %v571_v6 = vmax.f32 %v556_v60, 0.0  ;;  %v578_v49 = vpop.permute.xlu0 %577 }
 0x1b5   : > { %v561_v51 = vpop.f32.mrf.mxu1 }
 0x1b6   : > { %v562_v56 = vadd.f32 %v561_v51, %v459_v52  ;;  %v572_v5 = vmax.f32 %v560_v59, 0.0 }
 0x1b7   : > { %v563_v53 = vpop.f32.mrf.mxu1 }
 0x1b8   : > { %v564_v54 = vadd.f32 %v563_v53, %v464_v50  ;;  %v573_v3 = vmax.f32 %v562_v56, 0.0 }
 0x1b9   : > { %v565_v55 = vpop.f32.mrf.mxu1 }
 0x1ba   : > { %v566_v57 = vadd.f32 %v565_v55, %v464_v50  ;;  %v574_v1 = vmax.f32 %v564_v54, 0.0 }
 0x1bc   : > { %v575_v61 = vmax.f32 %v566_v57, 0.0 }
 0x1be   : > { %626 = vmatprep.subr.mxu0 %v575_v61 }
 0x1bf   : > { %627 = vmatpush1.msra.mxu0 %v574_v1 }
 0x1c0   : > { %628 = vmatprep.subr.mxu0 %v573_v3 }
 0x1c1   : > { %629 = vmatpush1.msra.mxu0 %v572_v5 }
 0x1c2   : > { %630 = vmatprep.subr.mxu0 %v571_v6 }
 0x1c3   : > { %631 = vmatpush1.msra.mxu0 %v570_v7 }
 0x1c4   : > { %632 = vmatprep.subr.mxu0 %v569_v9 }
 0x1c5   : > { %633 = vmatpush1.msra.mxu0 %v568_v10 }
 0x1c6   : > { %1147 = vmatmul.mubr.msk.bf16.vlgmr.msra.gmra.mxu0 %vm476_vm2, %v593_v16 }
 0x1c7   : > { %676 = vmatprep.mubr.bf16.mxu0 %v1244_v0 }
 0x1ce   : > { %1148 = vmatmul.mubr.msk.bf16.gmra.mxu0 %vm476_vm2, %v595_v17 }
 0x1cf   : > { %912 = vmatprep.mubr.bf16.mxu0 %v1244_v0 }
 0x286   : > { %v668_v19 = vpop.f32.mrf.mxu0 }
 0x287   : > { %v669_v55 = vadd.f32 %v668_v19, %v578_v49 }
 0x288   : > { %v670_v20 = vpop.f32.mrf.mxu0 }
 0x289   : > { %v671_v52 = vadd.f32 %v670_v20, %v578_v49  ;;  %v1474_v31 = vadd.f32 %v669_v55, %v430_v43 }
 0x28a   : > { %v672_v21 = vpop.f32.mrf.mxu0 }
 0x28b   : > { %v673_v51 = vadd.f32 %v672_v21, %v582_v44  ;;  %v1467_v29 = vadd.f32 %v671_v52, %v431_v42  ;;  %v695_v38 = vmax.f32 %v1474_v31, 0.0 }
 0x28c   : > { %v674_v22 = vpop.f32.mrf.mxu0 }
 0x28d   : > { %v675_v14 = vadd.f32 %v674_v22, %v582_v44  ;;  %v1462_v28 = vadd.f32 %v673_v51, %v432_v41  ;;  %v1250_v41 = vmov 3  }
 0x28e   : > { %v678_v24 = vpop.f32.mrf.mxu0  ;;  %1214 = vset.pattern.permute.xlu0 %v1250_v41  ;;  %1215 = vset.pattern.permute.xlu1 %v1250_v41 }
 0x28f   : > { %v679_v47 = vadd.f32 %v678_v24, %v586_v23  ;;  %v1457_v57 = vadd.f32 %v675_v14, %v433_v40  ;;  %v697_v36 = vmax.f32 %v1462_v28, 0.0  ;;  %v722_v40 = vpop.permute.xlu0 %721  ;;  %835 = vperm.xlu0 %1214, %v1336_v8   ;;  %831 = vperm.xlu1 %1215, %v1347_v11  }
 0x290   : > { %v680_v27 = vpop.f32.mrf.mxu0 }
 0x291   : > { %v681_v45 = vadd.f32 %v680_v27, %v586_v23  ;;  %v1453_v56 = vadd.f32 %v679_v47, %v434_v39  ;;  %v698_v34 = vmax.f32 %v1457_v57, 0.0  ;;  %v720_v39 = vpop.permute.xlu1 %719 }
 0x292   : > { %v682_v33 = vpop.f32.mrf.mxu0 }
 0x293   : > { %v683_v46 = vadd.f32 %v682_v33, %v590_v26  ;;  %v1445_v53 = vadd.f32 %v681_v45, %v435_v37  ;;  %v696_v37 = vmax.f32 %v1467_v29, 0.0  ;;  %823 = vperm.xlu0 %1214, %v1359_v13   ;;  %827 = vperm.xlu1 %1215, %v1353_v12   ;;  %v713_v2 = vpop.permute.xlu0 %712 }
 0x294   : > { %v684_v48 = vpop.f32.mrf.mxu0 }
 0x295   : > { %v685_v50 = vadd.f32 %v684_v48, %v590_v26  ;;  %v1441_v15 = vadd.f32 %v683_v46, %v436_v35  ;;  %v700_v30 = vmax.f32 %v1445_v53, 0.0  ;;  %v717_v59 = vpop.permute.xlu1 %716  ;;  %v1251_v26 = vmov 0.0  }
 0x296   : > { %313 = vst.msk [vmem:[#allocation2 + $0x10] sm:$0xff] %vm310_vm3, %v1251_v26  ;;  %311 = vst.msk [vmem:[#allocation2] sm:$0xff] %vm310_vm3, %v1251_v26 }
 0x297   : > { %v1449_v54 = vadd.f32 %v685_v50, %v437_v32  ;;  %v701_v35 = vmax.f32 %v1441_v15, 0.0  ;;  %v699_v32 = vmax.f32 %v1453_v56, 0.0  ;;  %v839_v23 = vpop.permute.xlu0 %838  ;;  %312 = vst.msk [vmem:[#allocation2 + $0x8] sm:$0xff] %vm310_vm3, %v1251_v26  ;;  %314 = vst.msk [vmem:[#allocation2 + $0x18] sm:$0xff] %vm310_vm3, %v1251_v26 }
 0x299   : > { %v702_v25 = vmax.f32 %v1449_v54, 0.0  ;;  %v709_v63 = vpop.permute.xlu1 %708 }
 0x29b   : > { %753 = vmatprep.subr.mxu1 %v702_v25 }
 0x29c   : > { %754 = vmatpush1.msra.mxu1 %v701_v35 }
 0x29d   : > { %755 = vmatprep.subr.mxu1 %v700_v30  ;;  %v705_v11 = vpop.permute.xlu1 %704  ;;  %v951_v54 = vld [vmem:[#allocation2 + $0x10] sm:$0xff] }
 0x29e   : > { %756 = vmatpush1.msra.mxu1 %v699_v32  ;;  %v952_v31 = vld [vmem:[#allocation2 + $0x18] sm:$0xff] }
 0x29f   : > { %757 = vmatprep.subr.mxu1 %v698_v34 }
 0x2a0   : > { %758 = vmatpush1.msra.mxu1 %v697_v36 }
 0x2a1   : > { %759 = vmatprep.subr.mxu1 %v696_v37  ;;  %v841_v24 = vpop.permute.xlu1 %840 }
 0x2a2   : > { %760 = vmatpush1.msra.mxu1 %v695_v38 }
 0x2a3   : > { %1149 = vmatmul.mubr.msk.bf16.vlgmr.msra.gmra.mxu1 %vm476_vm2, %v720_v39  ;;  %1162 = vmatprep.subr.mxu1 %v1251_v26 }
 0x2a4   : > { %803 = vmatprep.mubr.bf16.mxu1 %v1244_v0 }
 0x2ab   : > { %1150 = vmatmul.mubr.msk.bf16.gmra.mxu1 %vm476_vm2, %v722_v40 }
 0x2ac   : > { %1170 = vmatprep.mubr.msk.f32.mxu1 %vm1252_vm4, %v1251_v26 }
 0x30a   : > { %v832_v27 = vpop.permute.xlu1 %831  ;;  %v836_v45 = vpop.permute.xlu0 %835 }
 0x30e   : > { %v828_v47 = vpop.permute.xlu1 %827  ;;  %v824_v52 = vpop.permute.xlu0 %823 }
 0x363   : > { %v795_v42 = vpop.f32.mrf.mxu1 }
 0x364   : > { %v796_v17 = vadd.f32 %v795_v42, %v705_v11 }
 0x365   : > { %v797_v43 = vpop.f32.mrf.mxu1 }
 0x366   : > { %v798_v10 = vadd.f32 %v797_v43, %v705_v11  ;;  %v814_v22 = vmax.f32 %v796_v17, 0.0 }
 0x367   : > { %v799_v58 = vpop.f32.mrf.mxu1 }
 0x368   : > { %v800_v9 = vadd.f32 %v799_v58, %v709_v63  ;;  %v815_v21 = vmax.f32 %v798_v10, 0.0 }
 0x369   : > { %v801_v60 = vpop.f32.mrf.mxu1 }
 0x36a   : > { %v802_v7 = vadd.f32 %v801_v60, %v709_v63  ;;  %v816_v20 = vmax.f32 %v800_v9, 0.0 }
 0x36b   : > { %v805_v61 = vpop.f32.mrf.mxu1 }
 0x36c   : > { %v806_v6 = vadd.f32 %v805_v61, %v713_v2  ;;  %v817_v19 = vmax.f32 %v802_v7, 0.0  ;;  %v949_v7 = vld [vmem:[#allocation2] sm:$0xff] }
 0x36d   : > { %v807_v62 = vpop.f32.mrf.mxu1 }
 0x36e   : > { %v808_v5 = vadd.f32 %v807_v62, %v713_v2  ;;  %v818_v18 = vmax.f32 %v806_v6, 0.0 }
 0x36f   : > { %v809_v1 = vpop.f32.mrf.mxu1 }
 0x370   : > { %v810_v3 = vadd.f32 %v809_v1, %v717_v59  ;;  %v819_v16 = vmax.f32 %v808_v5, 0.0 }
 0x371   : > { %v811_v4 = vpop.f32.mrf.mxu1 }
 0x372   : > { %v812_v8 = vadd.f32 %v811_v4, %v717_v59  ;;  %v820_v12 = vmax.f32 %v810_v3, 0.0 }
 0x374   : > { %v821_v13 = vmax.f32 %v812_v8, 0.0 }
 0x376   : > { %872 = vmatprep.subr.mxu0 %v821_v13 }
 0x377   : > { %873 = vmatpush1.msra.mxu0 %v820_v12 }
 0x378   : > { %874 = vmatprep.subr.mxu0 %v819_v16 }
 0x379   : > { %875 = vmatpush1.msra.mxu0 %v818_v18 }
 0x37a   : > { %876 = vmatprep.subr.mxu0 %v817_v19 }
 0x37b   : > { %877 = vmatpush1.msra.mxu0 %v816_v20 }
 0x37c   : > { %878 = vmatprep.subr.mxu0 %v815_v21 }
 0x37d   : > { %879 = vmatpush1.msra.mxu0 %v814_v22  ;;  %v985_v22 = vld [vmem:[%s1563_s5] sm:$0x1f] }
 0x37e   : > { %1151 = vmatmul.mubr.msk.bf16.vlgmr.msra.gmra.mxu0 %vm476_vm2, %v839_v23  ;;  %v986_v23 = vld [vmem:[%s1564_s6] sm:$0x1f] }
 0x37f   : > { %922 = vmatprep.mubr.bf16.mxu0 %v1244_v0 }
 0x386   : > { %1152 = vmatmul.mubr.msk.bf16.gmra.mxu0 %vm476_vm2, %v841_v24 }
 0x43e   : > { %v914_v0 = vpop.f32.mrf.mxu0 }
 0x43f   : > { %v915_v59 = vadd.f32 %v914_v0, %v824_v52 }
 0x440   : > { %v916_v33 = vpop.f32.mrf.mxu0 }
 0x441   : > { %v917_v41 = vadd.f32 %v916_v33, %v824_v52 }
 0x442   : > { %v918_v44 = vpop.f32.mrf.mxu0 }
 0x443   : > { %v919_v50 = vadd.f32 %v918_v44, %v828_v47  ;;  %v934_v1 = vadd.f32 %v917_v41, %v696_v37 }
 0x444   : > { %v920_v46 = vpop.f32.mrf.mxu0 }
 0x445   : > { %v921_v49 = vadd.f32 %v920_v46, %v828_v47  ;;  %v935_v60 = vadd.f32 %v919_v50, %v697_v36  ;;  %v942_v3 = vmax.f32 %v934_v1, 0.0 }
 0x446   : > { %v924_v48 = vpop.f32.mrf.mxu0 }
 0x447   : > { %v925_v14 = vadd.f32 %v924_v48, %v832_v27  ;;  %v936_v42 = vadd.f32 %v921_v49, %v698_v34  ;;  %v933_v34 = vadd.f32 %v915_v59, %v695_v38  ;;  %v943_v28 = vmax.f32 %v935_v60, 0.0  ;;  %v950_v38 = vld [vmem:[#allocation2 + $0x8] sm:$0xff] }
 0x448   : > { %v926_v51 = vpop.f32.mrf.mxu0 }
 0x449   : > { %v937_v55 = vadd.f32 %v925_v14, %v699_v32  ;;  %v927_v39 = vadd.f32 %v926_v51, %v832_v27  ;;  %v944_v57 = vmax.f32 %v936_v42, 0.0 }
 0x44a   : > { %v928_v40 = vpop.f32.mrf.mxu0 }
 0x44b   : > { %v938_v43 = vadd.f32 %v927_v39, %v700_v30  ;;  %v929_v58 = vadd.f32 %v928_v40, %v836_v45  ;;  %v945_v62 = vmax.f32 %v937_v55, 0.0  ;;  %v956_v15 = vadd.f32 %v944_v57, %v943_v28 }
 0x44c   : > { %v930_v61 = vpop.f32.mrf.mxu0 }
 0x44d   : > { %v946_v63 = vmax.f32 %v938_v43, 0.0  ;;  %v939_v56 = vadd.f32 %v929_v58, %v701_v35  ;;  %v931_v32 = vadd.f32 %v930_v61, %v836_v45  ;;  %v941_v35 = vmax.f32 %v933_v34, 0.0 }
 0x44f   : > { %v940_v53 = vadd.f32 %v931_v32, %v702_v25  ;;  %v959_v30 = vadd.f32 %v946_v63, %v945_v62  ;;  %v947_v36 = vmax.f32 %v939_v56, 0.0  ;;  %v953_v29 = vadd.f32 %v942_v3, %v941_v35 }
 0x451   : > { %v948_v2 = vmax.f32 %v940_v53, 0.0  ;;  %960 = vadd.xlane.f32.xlu0 %v959_v30 }
 0x453   : > { %v962_v4 = vadd.f32 %v948_v2, %v947_v36 }
 0x455   : > { %963 = vadd.xlane.f32.xlu1 %v962_v4  ;;  %957 = vadd.xlane.f32.xlu0 %v956_v15 }
 0x459   : > { %954 = vadd.xlane.f32.xlu1 %v953_v29 }
 0x4da   : > { %v961_v25 = vpop.xlane.xlu0 %960 }
 0x4db   : > { %v967_v37 = vadd.f32 %v961_v25, %v951_v54 }
 0x4dd   : > { %972 = vst.msk [vmem:[#allocation2 + $0x10] sm:$0xff] %vm310_vm3, %v967_v37 }
 0x4de   : > { %v964_v5 = vpop.xlane.xlu1 %963  ;;  %v958_v8 = vpop.xlane.xlu0 %957 }
 0x4df   : > { %v968_v6 = vadd.f32 %v964_v5, %v952_v31  ;;  %v966_v11 = vadd.f32 %v958_v8, %v950_v38 }
 0x4e1   : > { %973 = vst.msk [vmem:[#allocation2 + $0x18] sm:$0xff] %vm310_vm3, %v968_v6  ;;  %971 = vst.msk [vmem:[#allocation2 + $0x8] sm:$0xff] %vm310_vm3, %v966_v11 }
 0x4e2   : > { %v955_v13 = vpop.xlane.xlu1 %954 }
 0x4e3   : > { %v965_v9 = vadd.f32 %v955_v13, %v949_v7 }
 0x4e4   : > { %v979_v10 = vld [vmem:[#allocation2 + $0x10] sm:$0xff] }
 0x4e5   : > { %970 = vst.msk [vmem:[#allocation2] sm:$0xff] %vm310_vm3, %v965_v9  ;;  %v983_v18 = vmul.f32 0.00390625, %v979_v10 }
 0x4e8   : > { %v980_v12 = vld [vmem:[#allocation2 + $0x18] sm:$0xff]  ;;  %v978_v17 = vld [vmem:[#allocation2 + $0x8] sm:$0xff] }
 0x4e9   : > { %v984_v16 = vmul.f32 0.00390625, %v980_v12  ;;  %v982_v20 = vmul.f32 0.00390625, %v978_v17 }
 0x4eb   : > { %1163 = vmatpush3.msra.mxu1 %v984_v16 }
 0x4ec   : > { %1164 = vmatprep.subr.mxu1 %v1251_v26  ;;  %v977_v19 = vld [vmem:[#allocation2] sm:$0xff] }
 0x4ed   : > { %1165 = vmatpush3.msra.mxu1 %v983_v18  ;;  %v981_v21 = vmul.f32 0.00390625, %v977_v19 }
 0x4ee   : > { %1166 = vmatprep.subr.mxu1 %v1251_v26 }
 0x4ef   : > { %1167 = vmatpush3.msra.mxu1 %v982_v20 }
 0x4f0   : > { %1168 = vmatprep.subr.mxu1 %v1251_v26 }
 0x4f1   : > { %1169 = vmatpush3.msra.mxu1 %v981_v21 }
 0x4f2   : > { %1171 = vmatmul.mubr.msk.f32.vlgmr.msra.gmra.mxu1 %vm476_vm2, %v985_v22 }
 0x5b2   : > { %v1056_v24 = vpop.f32.mrf.mxu1 }
 0x5b3   : > { %v1057_v0 = vadd.f32 %v1056_v24, %v986_v23 }
 0x5b4   : > { %v1172_v27 = vpop.f32.mrf.mxu1 }
 0x5b5   : > { %1061 = vst.msk [vmem:[%s304_s28] sm:$0x1f] %vm1060_vm5, %v1057_v0 }
 0x5b6 PF: > { %s17_s26 = sadd.s32 1, %s1242_s26   ;;  %s1566_s24 = smov %s1238_s25 }
 0x5b7   : > { %p14_p5 = scmp.ge.s32.totalorder %s17_s26, 4   ;;  %s1567_s25 = smov %s1569_s27 }
 0x5b9   :  { %16 = sbr.rel (!%p14_p5) target bundleno = 2 (0x2), region = 86 }

</bundles_post_ra>
